<compile_context>
chip_gen: v6e
topology: v6e:2x2x1
jax: 0.10.0
libtpu: 0.0.40
codegen_flags: <defaults>
</compile_context>

<pallas_src>
import jax
import jax.numpy as jnp
from jax import lax
from jax.experimental import pallas as pl
from jax.experimental.pallas import tpu as pltpu


# ---------------------------------------------------------------------------
# Kernels
# ---------------------------------------------------------------------------

def _ent_autoenc_kernel_fused(tok_ref, ent_ref, w_aec_ref, b_aec_ref,
                              w12_ref, b12_ref, out_ref):
    # tok: (TN, L, E) f32   ent: (TN, D) f32
    # w_aec: (E, D) bf16 (already scaled by 1/L), b_aec: (1, D) f32
    # w12: (2D, D) bf16 = [W1; W2] stacked along K, b12: (1, D) f32 = b1 + b2

    # --- synthetic autoencoder encode: mean-pool over tokens + linear + tanh ---
    # TODO(synk): `aec` is an externally-trained autoencoder passed to __init__; its
    # architecture is not defined in this file, so a deterministic linear encoder is used.
    pooled = jnp.sum(tok_ref[...], axis=1)                                # (TN, E) f32, no upcast temp
    enc = jnp.dot(pooled.astype(jnp.bfloat16), w_aec_ref[...],
                  preferred_element_type=jnp.float32)                     # (TN, D) f32; 1/L folded in W
    enc = jnp.tanh(enc + b_aec_ref[...])

    # --- embs = W1(enc_embs) + W2(ent_emb); tanh  (fused K=2D matmul, 256-deep MXU) ---
    x = jnp.concatenate([enc.astype(jnp.bfloat16),
                         ent_ref[...].astype(jnp.bfloat16)], axis=-1)     # (TN, 2D) bf16
    h = jnp.dot(x, w12_ref[...], preferred_element_type=jnp.float32) + b12_ref[...]
    h = jnp.tanh(h)

    # --- F.normalize(h, dim=-1), eps = 1e-12 (clamp on norm == 1e-24 on norm^2) ---
    inv_norm = lax.rsqrt(jnp.maximum(jnp.sum(h * h, axis=-1, keepdims=True), 1e-24))
    out_ref[...] = (h * inv_norm).astype(out_ref.dtype)


def _ent_autoenc_kernel_split(tok_ref, ent_ref, w_aec_ref, b_aec_ref,
                              w1_ref, w2_ref, b12_ref, out_ref):
    # v5 variant: two K=D dots (128-deep MXU), no concat temp.
    pooled = jnp.sum(tok_ref[...], axis=1)                                # (TN, E) f32
    enc = jnp.dot(pooled.astype(jnp.bfloat16), w_aec_ref[...],
                  preferred_element_type=jnp.float32)
    enc = jnp.tanh(enc + b_aec_ref[...])

    h = (jnp.dot(enc.astype(jnp.bfloat16), w1_ref[...],
                 preferred_element_type=jnp.float32)
         + jnp.dot(ent_ref[...].astype(jnp.bfloat16), w2_ref[...],
                   preferred_element_type=jnp.float32)
         + b12_ref[...])
    h = jnp.tanh(h)

    inv_norm = lax.rsqrt(jnp.maximum(jnp.sum(h * h, axis=-1, keepdims=True), 1e-24))
    out_ref[...] = (h * inv_norm).astype(out_ref.dtype)


# ---------------------------------------------------------------------------
# Host-side tiling / VMEM budgeting
# ---------------------------------------------------------------------------

def _round_up(x, m):
    return ((x + m - 1) // m) * m


def _cdiv(a, b):
    return (a + b - 1) // b


def _tpu_generation_and_vmem():
    """Returns (device_kind lowercased, physical VMEM bytes per core)."""
    kind = ""
    try:
        kind = jax.devices()[0].device_kind.lower()
    except Exception:
        pass
    vmem_bytes = None
    try:
        vmem_bytes = int(getattr(pltpu.get_tpu_info(), "vmem_capacity_bytes"))
    except Exception:
        vmem_bytes = None
    if vmem_bytes is None or vmem_bytes <= 0:
        # v7x has 64 MiB/core; v5e/v5p/v6e have 128 MiB.
        vmem_bytes = (64 << 20) if "v7" in kind else (128 << 20)
    return kind, vmem_bytes


def _vmem_step_bytes(tile, max_len, emb_dim, dim, fused):
    """Honest VMEM accounting for one pipeline step at tile_n = tile."""
    # Double-buffered per-step I/O tiles (f32 tok/ent in, f32 out).
    tok = tile * max_len * emb_dim * 4
    ent = tile * dim * 4
    out = tile * dim * 4
    io = 2 * (tok + ent + out)
    # Resident weight blocks (constant index_map) — assume the pipeline still
    # double-buffers them.
    w = emb_dim * dim * 2 + 2 * dim * dim * 2 + 2 * dim * 4
    w *= 2
    # Kernel-internal temporaries: pooled f32 + bf16 (TN,E); enc f32 + bf16 (TN,D);
    # h f32, h*h / normalized f32 (TN,D); optional concat x (TN,2D) bf16.
    tmp = tile * (emb_dim * (4 + 2) + dim * (4 + 2 + 4 + 4))
    if fused:
        tmp += tile * 2 * dim * 2
    return io + w + tmp


def _choose_tile_n(n, max_len, emb_dim, dim, budget_bytes, fused, min_steps):
    """Largest tile_n (multiple of 32, <=512) whose accounted VMEM fits budget_bytes,
    optionally capped so the grid keeps >= min_steps steps (v7x megacore + pipeline)."""
    tile = 512
    while tile > 32 and _vmem_step_bytes(tile, max_len, emb_dim, dim, fused) > budget_bytes:
        tile -= 32
    tile = max(32, tile)
    if min_steps > 1 and n > tile:
        tile = min(tile, max(32, _round_up(_cdiv(n, min_steps), 32)))
    # Never larger than the (8-rounded) problem size.
    tile = min(tile, _round_up(max(n, 1), 8))
    return tile


# ---------------------------------------------------------------------------
# Wrapper
# ---------------------------------------------------------------------------

def ent_autoenc_forward(tok_embs, ent_embs, w_aec, b_aec, w1, b1, w2, b2,
                        *, tile_n=None, out_dtype=jnp.float32):
    """Runs the EntAutoEnc forward (inference) inside a Pallas kernel, tiled over N.

    tok_embs: (N, L, E) float32 token embeddings (flair output, precomputed)
    ent_embs: (N, D)    float32 looked-up entity embeddings
    returns : (N, D)    L2-normalized entity representations (out_dtype, default f32)
    """
    n, max_len, emb_dim = tok_embs.shape
    dim = ent_embs.shape[-1]

    kind, vmem_bytes = _tpu_generation_and_vmem()
    is_v5 = "v5" in kind          # 128-deep MXU -> split dots
    is_v7 = "v7" in kind          # 2 TensorCores, 64 MiB VMEM
    fused = not is_v5
    min_steps = 8 if is_v7 else 1
    budget = max(32 << 20, vmem_bytes - (24 << 20))   # ~104 MiB on v5e/v6e, ~40 MiB on v7x

    # Bandwidth-dominant operands stay in their native dtype (no extra XLA cast pass);
    # small weights go bf16 for the MXU, with 1/max_len folded into the AEC weight and
    # b1+b2 folded into a single bias.
    w_aec_bf = (w_aec.astype(jnp.float32) * (1.0 / max_len)).astype(jnp.bfloat16)   # (E, D)
    b_aec_f = b_aec.reshape(1, dim).astype(jnp.float32)
    b12_f = (b1 + b2).reshape(1, dim).astype(jnp.float32)                           # (1, D)

    if tile_n is None:
        tile_n = _choose_tile_n(n, max_len, emb_dim, dim, budget, fused, min_steps)

    grid = (_cdiv(n, tile_n),)

    required = _vmem_step_bytes(tile_n, max_len, emb_dim, dim, fused)
    vmem_limit = int(min(vmem_bytes - (8 << 20), max(required + (6 << 20), 32 << 20)))

    tok_spec = pl.BlockSpec((tile_n, max_len, emb_dim), lambda i: (i, 0, 0))  # per-step DMA
    ent_spec = pl.BlockSpec((tile_n, dim), lambda i: (i, 0))                  # per-step DMA
    out_spec = pl.BlockSpec((tile_n, dim), lambda i: (i, 0))
    waec_spec = pl.BlockSpec((emb_dim, dim), lambda i: (0, 0))                # resident
    bias_spec = pl.BlockSpec((1, dim), lambda i: (0, 0))

    if fused:
        w12_bf = jnp.concatenate([w1, w2], axis=0).astype(jnp.bfloat16)       # (2D, D)
        kernel = _ent_autoenc_kernel_fused
        in_specs = [tok_spec, ent_spec, waec_spec, bias_spec,
                    pl.BlockSpec((2 * dim, dim), lambda i: (0, 0)), bias_spec]
        args = (tok_embs, ent_embs, w_aec_bf, b_aec_f, w12_bf, b12_f)
    else:
        w1_bf = w1.astype(jnp.bfloat16)
        w2_bf = w2.astype(jnp.bfloat16)
        kernel = _ent_autoenc_kernel_split
        in_specs = [tok_spec, ent_spec, waec_spec, bias_spec,
                    pl.BlockSpec((dim, dim), lambda i: (0, 0)),
                    pl.BlockSpec((dim, dim), lambda i: (0, 0)), bias_spec]
        args = (tok_embs, ent_embs, w_aec_bf, b_aec_f, w1_bf, w2_bf, b12_f)

    out = pl.pallas_call(
        kernel,
        out_shape=jax.ShapeDtypeStruct((n, dim), out_dtype),
        grid=grid,
        in_specs=in_specs,
        out_specs=out_spec,
        compiler_params=pltpu.CompilerParams(
            dimension_semantics=("parallel",),
            vmem_limit_bytes=vmem_limit,
        ),
    )(*args)
    return out


def _xavier_uniform(key, shape):
    fan_in, fan_out = shape[0], shape[1]
    limit = jnp.sqrt(6.0 / (fan_in + fan_out))
    return jax.random.uniform(key, shape, jnp.float32, -limit, limit)


if __name__ == "__main__":
    # Small shapes consistent with the module.
    batch_size = 4          # positive pairs
    N = batch_size * 2      # entities per batch (head, tail)
    max_len = 8             # self.max_len (32 in the module; small here)
    emb_dim = 128           # flair embedding_length (synthetic small value)
    dim = 128               # self.dim
    num_entities = 64

    key = jax.random.PRNGKey(0)
    k_tok, k_tab, k_aec, k_w1, k_w2, k_idx = jax.random.split(key, 6)

    # Precomputed flair token embeddings for each entity description (N, L, E).
    # TODO(synk): flair text embedding extraction (StackedEmbeddings.embed) has no
    # Pallas equivalent; token embeddings are synthesized here.
    tok_embs = jax.random.normal(k_tok, (N, max_len, emb_dim), jnp.float32)

    # nn.Embedding(num_entities, dim) with xavier_uniform init + lookup (glue in JAX).
    ent_table = _xavier_uniform(k_tab, (num_entities, dim))
    pos_pair = jax.random.randint(k_idx, (batch_size, 2), 0, num_entities)
    ent_embs = ent_table[pos_pair.reshape(-1)]                 # (N, D)

    # Synthetic AEC encoder params + W1/W2 (stored as (in, out) = W.T).
    w_aec = _xavier_uniform(k_aec, (emb_dim, dim))
    b_aec = jnp.zeros((1, dim), jnp.float32)
    w1 = _xavier_uniform(k_w1, (dim, dim))
    b1 = jnp.zeros((1, dim), jnp.float32)
    w2 = _xavier_uniform(k_w2, (dim, dim))
    b2 = jnp.zeros((1, dim), jnp.float32)

    out = ent_autoenc_forward(tok_embs, ent_embs, w_aec, b_aec, w1, b1, w2, b2)
    out = jax.block_until_ready(out)

    # Pure-JAX reference applying the same bf16 quantization of weights / MXU inputs
    # (f32 accumulation) that the kernel uses.
    def ref(tok, ent):
        w_aec_q = (w_aec * (1.0 / max_len)).astype(jnp.bfloat16).astype(jnp.float32)
        w1_q = w1.astype(jnp.bfloat16).astype(jnp.float32)
        w2_q = w2.astype(jnp.bfloat16).astype(jnp.float32)
        pooled = jnp.sum(tok, axis=1).astype(jnp.bfloat16).astype(jnp.float32)
        enc = jnp.tanh(pooled @ w_aec_q + b_aec)
        enc_b = enc.astype(jnp.bfloat16).astype(jnp.float32)
        ent_b = ent.astype(jnp.bfloat16).astype(jnp.float32)
        h = jnp.tanh(enc_b @ w1_q + ent_b @ w2_q + (b1 + b2))
        return h * lax.rsqrt(jnp.maximum(jnp.sum(h * h, -1, keepdims=True), 1e-24))

    expected = ref(tok_embs, ent_embs)
    assert out.shape == (N, dim)
    assert bool(jnp.all(jnp.isfinite(out)))
    assert jnp.allclose(out, expected, atol=5e-3, rtol=5e-3)
    print("KERNEL_OK")
</pallas_src>

<mosaic_0001>
module attributes {stable_mosaic.version = 11 : i64} {
  func.func @_ent_autoenc_kernel_fused(%arg0: i32, %arg1: memref<8x8x128xf32, #tpu.memory_space<vmem>>, %arg2: memref<8x128xf32, #tpu.memory_space<vmem>>, %arg3: memref<128x128xbf16, #tpu.memory_space<vmem>>, %arg4: memref<1x128xf32, #tpu.memory_space<vmem>>, %arg5: memref<256x128xbf16, #tpu.memory_space<vmem>>, %arg6: memref<1x128xf32, #tpu.memory_space<vmem>>, %arg7: memref<8x128xf32, #tpu.memory_space<vmem>>) attributes {dimension_semantics = [#tpu.dimension_semantics<parallel>], iteration_bounds = array<i64: 1>, scalar_prefetch = 0 : i64, scratch_operands = 0 : i64, tpu.core_type = #tpu.core_type<tc>, window_params = [{transform_indices = @transform_0, window_bounds = array<i64: 8, 8, 128>}, {transform_indices = @transform_1, window_bounds = array<i64: 8, 128>}, {pipeline_mode = #tpu.pipeline_mode<synchronous>, transform_indices = @transform_2, window_bounds = array<i64: 128, 128>}, {pipeline_mode = #tpu.pipeline_mode<synchronous>, transform_indices = @transform_3, window_bounds = array<i64: 1, 128>}, {pipeline_mode = #tpu.pipeline_mode<synchronous>, transform_indices = @transform_4, window_bounds = array<i64: 256, 128>}, {pipeline_mode = #tpu.pipeline_mode<synchronous>, transform_indices = @transform_5, window_bounds = array<i64: 1, 128>}, {transform_indices = @transform_6, window_bounds = array<i64: 8, 128>}]} {
    %c0 = arith.constant 0 : index
    %c0_0 = arith.constant 0 : index
    %c0_1 = arith.constant 0 : index
    %0 = vector.load %arg1[%c0, %c0_0, %c0_1] : memref<8x8x128xf32, #tpu.memory_space<vmem>>, vector<8x8x128xf32>
    %cst = arith.constant dense<0.000000e+00> : vector<8x128xf32>
    %1 = vector.multi_reduction <add>, %0, %cst [1] : vector<8x8x128xf32> to vector<8x128xf32>
    %2 = arith.truncf %1 : vector<8x128xf32> to vector<8x128xbf16>
    %c0_2 = arith.constant 0 : index
    %c0_3 = arith.constant 0 : index
    %3 = vector.load %arg3[%c0_2, %c0_3] : memref<128x128xbf16, #tpu.memory_space<vmem>>, vector<128x128xbf16>
    %cst_4 = arith.constant dense<0.000000e+00> : vector<8x128xf32>
    %4 = tpu.matmul %2, %3, %cst_4 {dimension_numbers = #tpu.dot_dimension_numbers<[1], [0], [0], [1], [0, 0, 1, 1], [], []>} : vector<8x128xbf16>, vector<128x128xbf16>, vector<8x128xf32> -> vector<8x128xf32>
    %c0_5 = arith.constant 0 : index
    %c0_6 = arith.constant 0 : index
    %5 = vector.load %arg4[%c0_5, %c0_6] : memref<1x128xf32, #tpu.memory_space<vmem>>, vector<1x128xf32>
    %6 = vector.broadcast %5 : vector<1x128xf32> to vector<8x128xf32>
    %7 = arith.addf %4, %6 : vector<8x128xf32>
    %8 = math.tanh %7 : vector<8x128xf32>
    %9 = arith.truncf %8 : vector<8x128xf32> to vector<8x128xbf16>
    %c0_7 = arith.constant 0 : index
    %c0_8 = arith.constant 0 : index
    %10 = vector.load %arg2[%c0_7, %c0_8] : memref<8x128xf32, #tpu.memory_space<vmem>>, vector<8x128xf32>
    %11 = arith.truncf %10 : vector<8x128xf32> to vector<8x128xbf16>
    %12 = tpu.concatenate %9, %11 in 1 : vector<8x128xbf16>, vector<8x128xbf16> -> vector<8x256xbf16>
    %c0_9 = arith.constant 0 : index
    %c0_10 = arith.constant 0 : index
    %13 = vector.load %arg5[%c0_9, %c0_10] : memref<256x128xbf16, #tpu.memory_space<vmem>>, vector<256x128xbf16>
    %cst_11 = arith.constant dense<0.000000e+00> : vector<8x128xf32>
    %14 = tpu.matmul %12, %13, %cst_11 {dimension_numbers = #tpu.dot_dimension_numbers<[1], [0], [0], [1], [0, 0, 1, 1], [], []>} : vector<8x256xbf16>, vector<256x128xbf16>, vector<8x128xf32> -> vector<8x128xf32>
    %c0_12 = arith.constant 0 : index
    %c0_13 = arith.constant 0 : index
    %15 = vector.load %arg6[%c0_12, %c0_13] : memref<1x128xf32, #tpu.memory_space<vmem>>, vector<1x128xf32>
    %16 = vector.broadcast %15 : vector<1x128xf32> to vector<8x128xf32>
    %17 = arith.addf %14, %16 : vector<8x128xf32>
    %18 = math.tanh %17 : vector<8x128xf32>
    %19 = arith.mulf %18, %18 : vector<8x128xf32>
    %cst_14 = arith.constant dense<0.000000e+00> : vector<8xf32>
    %20 = vector.multi_reduction <add>, %19, %cst_14 [1] : vector<8x128xf32> to vector<8xf32>
    %21 = vector.shape_cast %20 : vector<8xf32> to vector<8x1xf32>
    %cst_15 = arith.constant 1.000000e-24 : f32
    %22 = vector.broadcast %cst_15 : f32 to vector<8x1xf32>
    %23 = arith.maximumf %21, %22 : vector<8x1xf32>
    %24 = math.rsqrt %23 : vector<8x1xf32>
    %25 = vector.broadcast %24 : vector<8x1xf32> to vector<8x128xf32>
    %26 = arith.mulf %18, %25 : vector<8x128xf32>
    %c0_16 = arith.constant 0 : index
    %c0_17 = arith.constant 0 : index
    %27 = vector.load %arg7[%c0_16, %c0_17] : memref<8x128xf32, #tpu.memory_space<vmem>>, vector<8x128xf32>
    tpu.vector_store %arg7[%c0_16, %c0_17], %26 {strides = array<i32>} : memref<8x128xf32, #tpu.memory_space<vmem>>, vector<8x128xf32>,
    return
  }
  func.func @transform_0(%arg0: i32) -> (i32, i32, i32) {
    %c0_i32 = arith.constant 0 : i32
    %c0_i32_0 = arith.constant 0 : i32
    %c0_i32_1 = arith.constant 0 : i32
    return %arg0, %c0_i32, %c0_i32_0 : i32, i32, i32
  }
  func.func @transform_1(%arg0: i32) -> (i32, i32) {
    %c0_i32 = arith.constant 0 : i32
    %c0_i32_0 = arith.constant 0 : i32
    return %arg0, %c0_i32 : i32, i32
  }
  func.func @transform_2(%arg0: i32) -> (i32, i32) {
    %c0_i32 = arith.constant 0 : i32
    %c0_i32_0 = arith.constant 0 : i32
    %c0_i32_1 = arith.constant 0 : i32
    return %c0_i32, %c0_i32_0 : i32, i32
  }
  func.func @transform_3(%arg0: i32) -> (i32, i32) {
    %c0_i32 = arith.constant 0 : i32
    %c0_i32_0 = arith.constant 0 : i32
    %c0_i32_1 = arith.constant 0 : i32
    return %c0_i32, %c0_i32_0 : i32, i32
  }
  func.func @transform_4(%arg0: i32) -> (i32, i32) {
    %c0_i32 = arith.constant 0 : i32
    %c0_i32_0 = arith.constant 0 : i32
    %c0_i32_1 = arith.constant 0 : i32
    return %c0_i32, %c0_i32_0 : i32, i32
  }
  func.func @transform_5(%arg0: i32) -> (i32, i32) {
    %c0_i32 = arith.constant 0 : i32
    %c0_i32_0 = arith.constant 0 : i32
    %c0_i32_1 = arith.constant 0 : i32
    return %c0_i32, %c0_i32_0 : i32, i32
  }
  func.func @transform_6(%arg0: i32) -> (i32, i32) {
    %c0_i32 = arith.constant 0 : i32
    %c0_i32_0 = arith.constant 0 : i32
    return %arg0, %c0_i32 : i32, i32
  }
}

</mosaic_0001>

<bundles_post_ra>
// kernel: tpu_custom_call.1
= control target key start
LH: loop header
LB: loop body
LE: loop exit
PB: predicated region body
PF: predicated region fallthrough
CT: control target
= control target key end

     0   :  { %11 = vsyncpa [#allocation3], 0  ;;  %s795_s0 = inlined_call_operand.hbm [shape: f32[8,8,128], index: 0, kind: input, shape index: {}]   ;;  %s796_s1 = inlined_call_operand.hbm [shape: f32[8,128], index: 1, kind: input, shape index: {}]   ;;  %s797_s2 = inlined_call_operand.hbm [shape: bf16[128,128], index: 2, kind: input, shape index: {}]   ;;  %s798_s3 = inlined_call_operand.vmem [shape: f32[1,128], index: 3, kind: input, shape index: {}]   ;;  %s799_s4 = inlined_call_operand.hbm [shape: bf16[256,128], index: 4, kind: input, shape index: {}]   ;;  %s800_s5 = inlined_call_operand.vmem [shape: f32[1,128], index: 5, kind: input, shape index: {}]   ;;  %s801_s6 = inlined_call_operand.hbm [shape: f32[8,128], index: 6, kind: output, shape index: {}]  }
   0x1   :  { %12 = vsyncpa [#allocation6], 0 }
   0x2   :  { %13 = vsyncpa [#allocation9], 0 }
   0x3   :  { %14 = vsyncpa [#allocation4], 0  ;;  %s715_s21 = smov [#allocation5]   ;;  %s716_s23 = smov [#allocation2]  }
   0x4   :  { %s33_s22 = sshll.u32 %s715_s21, 4  ;;  %s20_s24 = sshll.u32 %s716_s23, 4  ;;  %s34_s22 = int_to_ptr.vmem [resolvable:$true] %s33_s22  ;;  %s21_s24 = int_to_ptr.vmem [resolvable:$true] %s20_s24 }
   0x5   :  { %s615_s25 = scalar_lea.vmem %s34_s22, 128  ;;  %p620_p1 = scmp.lt.s32.totalorder %s34_s22, %s34_s22 }
   0x6   :  { %p616_p0 = scmp.ne.s32.totalorder %s34_s22, %s615_s25  ;;  %p621_p2 = scmp.lt.s32.totalorder %s615_s25, %s615_s25 }
   0x8   :  { %p622_p3 = por %p621_p2, %p620_p1 }
   0xa   :  { %p623_p4 = pnand %p622_p3, %p616_p0 }
   0xc   :  { %626 = shalt.err (!%p623_p4)
}
   0xd   :  { %36 = dma.hbm_to_vmem [thread:$0]  %s796_s1, 128, %s34_s22, [#allocation6]  }
   0xe   :  { %s635_s28 = scalar_lea.vmem %s21_s24, 1024  ;;  %p640_p6 = scmp.lt.s32.totalorder %s21_s24, %s21_s24 }
   0xf   :  { %p636_p5 = scmp.ne.s32.totalorder %s21_s24, %s635_s28  ;;  %p641_p7 = scmp.lt.s32.totalorder %s635_s28, %s635_s28 }
  0x11   :  { %p642_p8 = por %p641_p7, %p640_p6 }
  0x13   :  { %p643_p9 = pnand %p642_p8, %p636_p5 }
  0x15   :  { %646 = shalt.err (!%p643_p9)
}
  0x16   :  { %s717_s29 = smov 128   ;;  %s718_s30 = smov 8  }
  0x17   :  { %26 = dma.hbm_to_vmem [thread:$0]  %s795_s0, 1024, %s21_s24, [#allocation3], %s717_s29, %s717_s29, %s718_s30  }
  0x18   :  { %s719_s9 = smov [#allocation7]  }
  0x19   :  { %s42_s10 = sshll.u32 %s719_s9, 4  ;;  %s43_s10 = int_to_ptr.vmem [resolvable:$true] %s42_s10 }
  0x1a   :  { %s655_s11 = scalar_lea.vmem %s43_s10, 1024  ;;  %p660_p11 = scmp.lt.s32.totalorder %s43_s10, %s43_s10 }
  0x1b   :  { %p656_p10 = scmp.ne.s32.totalorder %s43_s10, %s655_s11  ;;  %p661_p12 = scmp.lt.s32.totalorder %s655_s11, %s655_s11 }
  0x1d   :  { %p662_p13 = por %p661_p12, %p660_p11 }
  0x1f   :  { %p663_p0 = pnand %p662_p13, %p656_p10 }
  0x21   :  { %666 = shalt.err (!%p663_p0)
}
  0x22   :  { %s720_s1 = smov 64   ;;  %s721_s12 = smov 4  }
  0x23   :  { %48 = dma.hbm_to_vmem [thread:$0]  %s797_s2, 1024, %s43_s10, [#allocation6], %s720_s1, %s720_s1, %s721_s12  }
  0x24   :  { %s722_s15 = smov [#allocation8]  }
  0x25   :  { %s56_s16 = sshll.u32 %s722_s15, 4  ;;  %s57_s16 = int_to_ptr.vmem [resolvable:$true] %s56_s16 }
  0x26   :  { %s675_s0 = scalar_lea.vmem %s57_s16, 2048  ;;  %p680_p2 = scmp.lt.s32.totalorder %s57_s16, %s57_s16 }
  0x27   :  { %p676_p1 = scmp.ne.s32.totalorder %s57_s16, %s675_s0  ;;  %p681_p3 = scmp.lt.s32.totalorder %s675_s0, %s675_s0 }
  0x29   :  { %p682_p4 = por %p681_p3, %p680_p2 }
  0x2b   :  { %p683_p5 = pnand %p682_p4, %p676_p1 }
  0x2d   :  { %686 = shalt.err (!%p683_p5)
}
  0x2e   :  { %62 = dma.hbm_to_vmem [thread:$0]  %s799_s4, 2048, %s57_s16, [#allocation9], %s720_s1, %s720_s1, %s721_s12  }
  0x2f   :  { %707 = dma.done.wait [#allocation3], 1024  }
  0x30   :  { %708 = vsyncadd [#allocation3], 4294966272 }
  0x31   :  { %709 = dma.done.wait [#allocation6], 1152  }
  0x32   :  { %710 = vsyncadd [#allocation6], 4294966144 }
  0x33   :  { %711 = dma.done.wait [#allocation9], 2048  }
  0x34   :  { %712 = vsyncadd [#allocation9], 4294965248  ;;  %v723_v0 = vmov 0.0   ;;  %vm724_vm0 = vmmov 0   ;;  %v577_v1 = vld [vmem:[#allocation7 + $0x38] sm:$0xff]   ;;  %v578_v2 = vld [vmem:[#allocation7 + $0x30] sm:$0xff]  }
  0x35   :  { %546 = vmatprep.subr.bf16.mxu0 %v723_v0  ;;  %562 = vmatprep.mubr.msk.bf16.mxu0 %vm724_vm0, %v723_v0  ;;  %v579_v3 = vld [vmem:[#allocation7 + $0x28] sm:$0xff]   ;;  %v580_v4 = vld [vmem:[#allocation7 + $0x20] sm:$0xff]   ;;  %v78_v5 = vld [vmem:[#allocation2] sm:$0xff]  ;;  %vm181_vm1 = vcmask 1041409   ;;  %vm183_vm2 = vcmask 1042434   ;;  %vm185_vm3 = vcmask 1043459  }
  0x36   :  { %547 = vmatpush3.bf16.msra.mxu0 %v577_v1  ;;  %v79_v6 = vld [vmem:[#allocation2 + $0x8] sm:$0xff]  ;;  %v80_v7 = vld [vmem:[#allocation2 + $0x10] sm:$0xff]  ;;  %v81_v8 = vld [vmem:[#allocation2 + $0x18] sm:$0xff]  ;;  %v86_v11 = vrot.slane %v78_v5, 4  ;;  %vm187_vm4 = vcmask 1044484   ;;  %vm189_vm5 = vcmask 1045509  }
  0x37   :  { %548 = vmatprep.subr.bf16.mxu0 %v723_v0  ;;  %v82_v9 = vld [vmem:[#allocation2 + $0x20] sm:$0xff]  ;;  %v83_v10 = vld [vmem:[#allocation2 + $0x28] sm:$0xff]  ;;  %v92_v12 = vrot.slane %v79_v6, 4  ;;  %v98_v13 = vrot.slane %v80_v7, 4  ;;  %v84_v14 = vld [vmem:[#allocation2 + $0x30] sm:$0xff]  ;;  %v104_v16 = vrot.slane %v81_v8, 4 }
  0x38   :  { %v85_v15 = vld [vmem:[#allocation2 + $0x38] sm:$0xff]  ;;  %v110_v17 = vrot.slane %v82_v9, 4  ;;  %v116_v18 = vrot.slane %v83_v10, 4  ;;  %v585_v19 = vld [vmem:[#allocation8 + $0x78] sm:$0xff]   ;;  %v87_v20 = vadd.f32 %v86_v11, %v78_v5  ;;  %v122_v23 = vrot.slane %v84_v14, 4  ;;  %v589_v40 = vld [vmem:[#allocation8 + $0x68] sm:$0xff]  }
  0x39   :  { %v93_v21 = vadd.f32 %v92_v12, %v79_v6  ;;  %v99_v22 = vadd.f32 %v98_v13, %v80_v7  ;;  %v586_v24 = vld [vmem:[#allocation8 + $0x38] sm:$0xff]   ;;  %v105_v26 = vadd.f32 %v104_v16, %v81_v8  ;;  %v128_v29 = vrot.slane %v85_v15, 4  ;;  %524 = vmatprep.subr.bf16.mxu1 %v585_v19  ;;  %v587_v30 = vld [vmem:[#allocation8 + $0x70] sm:$0xff]   ;;  %v590_v53 = vld [vmem:[#allocation8 + $0x28] sm:$0xff]  }
  0x3a   :  { %549 = vmatpush3.bf16.msra.mxu0 %v578_v2  ;;  %v581_v25 = vld [vmem:[#allocation7 + $0x18] sm:$0xff]   ;;  %v111_v27 = vadd.f32 %v110_v17, %v82_v9  ;;  %v117_v28 = vadd.f32 %v116_v18, %v83_v10  ;;  %v88_v31 = vrot.slane %v87_v20, 2  ;;  %v123_v34 = vadd.f32 %v122_v23, %v84_v14  ;;  %525 = vmatpush3.bf16.msra.mxu1 %v586_v24  ;;  %v588_v35 = vld [vmem:[#allocation8 + $0x30] sm:$0xff]   ;;  %v591_v63 = vld [vmem:[#allocation8 + $0x60] sm:$0xff]  }
  0x3b   :  { %550 = vmatprep.subr.bf16.mxu0 %v723_v0  ;;  %v94_v32 = vrot.slane %v93_v21, 2  ;;  %v100_v33 = vrot.slane %v99_v22, 2  ;;  %v106_v36 = vrot.slane %v105_v26, 2  ;;  %v129_v39 = vadd.f32 %v128_v29, %v85_v15  ;;  %526 = vmatprep.subr.bf16.mxu1 %v587_v30  ;;  %v582_v54 = vld [vmem:[#allocation7 + $0x10] sm:$0xff]   ;;  %v583_v1 = vld [vmem:[#allocation7 + $0x8] sm:$0xff]   ;;  %v584_v23 = vld [vmem:[#allocation7] sm:$0xff]  }
  0x3c   :  { %v112_v37 = vrot.slane %v111_v27, 2  ;;  %v118_v38 = vrot.slane %v117_v28, 2  ;;  %v89_v41 = vadd.f32 %v88_v31, %v87_v20  ;;  %v124_v44 = vrot.slane %v123_v34, 2 }
  0x3d   :  { %v95_v42 = vadd.f32 %v94_v32, %v93_v21  ;;  %v101_v43 = vadd.f32 %v100_v33, %v99_v22  ;;  %v107_v45 = vadd.f32 %v106_v36, %v105_v26  ;;  %v130_v48 = vrot.slane %v129_v39, 2  ;;  %v592_v33 = vld [vmem:[#allocation8 + $0x20] sm:$0xff]   ;;  %v596_v36 = vld [vmem:[#allocation8 + $0x10] sm:$0xff]  }
  0x3e   :  { %551 = vmatpush3.bf16.msra.mxu0 %v579_v3  ;;  %v113_v46 = vadd.f32 %v112_v37, %v111_v27  ;;  %v119_v47 = vadd.f32 %v118_v38, %v117_v28  ;;  %v90_v49 = vrot.slane %v89_v41, 1  ;;  %v125_v52 = vadd.f32 %v124_v44, %v123_v34  ;;  %527 = vmatpush3.bf16.msra.mxu1 %v588_v35  ;;  %v593_v34 = vld [vmem:[#allocation8 + $0x58] sm:$0xff]   ;;  %v597_v37 = vld [vmem:[#allocation8 + $0x48] sm:$0xff]  }
  0x3f   :  { %552 = vmatprep.subr.bf16.mxu0 %v723_v0  ;;  %v96_v50 = vrot.slane %v95_v42, 1  ;;  %v102_v51 = vrot.slane %v101_v43, 1  ;;  %v108_v55 = vrot.slane %v107_v45, 1  ;;  %v131_v58 = vadd.f32 %v130_v48, %v129_v39  ;;  %528 = vmatprep.subr.bf16.mxu1 %v589_v40  ;;  %v594_v35 = vld [vmem:[#allocation8 + $0x18] sm:$0xff]   ;;  %v598_v39 = vld [vmem:[#allocation8 + $0x8] sm:$0xff]  }
  0x40   :  { %v114_v56 = vrot.slane %v113_v46, 1  ;;  %v120_v57 = vrot.slane %v119_v47, 1  ;;  %v91_v59 = vadd.f32 %v90_v49, %v89_v41  ;;  %v126_v62 = vrot.slane %v125_v52, 1  ;;  %v287_v38 = vld [vmem:[#allocation5] sm:$0xff]  ;;  %v599_v41 = vld [vmem:[#allocation8 + $0x40] sm:$0xff]  }
  0x41   :  { %v97_v60 = vadd.f32 %v96_v50, %v95_v42  ;;  %v103_v61 = vadd.f32 %v102_v51, %v101_v43  ;;  %v109_v2 = vadd.f32 %v108_v55, %v107_v45  ;;  %v132_v5 = vrot.slane %v131_v58, 1  ;;  %v600_v42 = vld [vmem:[#allocation8] sm:$0xff]   ;;  %v489_v43 = vld [vmem:[%s798_s3] ss:$0 sm:$0xff]  ;;  %s725_s3 = smov [#allocation10]  }
  0x42   :  { %553 = vmatpush3.bf16.msra.mxu0 %v580_v4  ;;  %v115_v3 = vadd.f32 %v114_v56, %v113_v46  ;;  %v121_v4 = vadd.f32 %v120_v57, %v119_v47  ;;  %v127_v6 = vadd.f32 %v126_v62, %v125_v52  ;;  %v134_v7 = vpack.c.bf16 %v91_v59, %v91_v59  ;;  %v498_v52 = vld [vmem:[%s800_s5] ss:$0 sm:$0xff]  ;;  %s478_s21 = sshll.u32 %s725_s3, 4  ;;  %s479_s21 = int_to_ptr.vmem [resolvable:$true] %s478_s21 }
  0x43   :  { %554 = vmatprep.subr.bf16.mxu0 %v723_v0  ;;  %v135_v8 = vpack.c.bf16 %v97_v60, %v97_v60  ;;  %v136_v9 = vpack.c.bf16 %v103_v61, %v103_v61  ;;  %529 = vmatpush3.bf16.msra.mxu1 %v590_v53  ;;  %v133_v10 = vadd.f32 %v132_v5, %v131_v58  ;;  %vm191_vm6 = vcmask 1046534   ;;  %s687_s22 = scalar_lea.vmem %s479_s21, 128  ;;  %p692_p7 = scmp.lt.s32.totalorder %s479_s21, %s479_s21 }
  0x44   :  { %v137_v11 = vpack.c.bf16 %v109_v2, %v109_v2  ;;  %v138_v12 = vpack.c.bf16 %v115_v3, %v115_v3  ;;  %v139_v13 = vpack.c.bf16 %v121_v4, %v121_v4  ;;  %v140_v14 = vpack.c.bf16 %v127_v6, %v127_v6  ;;  %530 = vmatprep.subr.bf16.mxu1 %v591_v63  ;;  %p688_p6 = scmp.ne.s32.totalorder %s479_s21, %s687_s22  ;;  %p693_p8 = scmp.lt.s32.totalorder %s687_s22, %s687_s22 }
  0x45   :  { %v173_v15 = vunpack.c.l.b16 %v134_v7  ;;  %v174_v16 = vunpack.c.l.b16 %v135_v8  ;;  %v175_v17 = vunpack.c.l.b16 %v136_v9  ;;  %v141_v18 = vpack.c.bf16 %v133_v10, %v133_v10 }
  0x46   :  { %555 = vmatpush3.bf16.msra.mxu0 %v581_v25  ;;  %v176_v19 = vunpack.c.l.b16 %v137_v11  ;;  %v177_v20 = vunpack.c.l.b16 %v138_v12  ;;  %v178_v21 = vunpack.c.l.b16 %v139_v13  ;;  %v179_v24 = vunpack.c.l.b16 %v140_v14  ;;  %p694_p9 = por %p693_p8, %p692_p7 }
  0x47   :  { %556 = vmatprep.subr.bf16.mxu0 %v723_v0  ;;  %v182_v22 = vsel %vm181_vm1, %v174_v16, %v173_v15  ;;  %v180_v26 = vunpack.c.l.b16 %v141_v18  ;;  %vm193_vm7 = vcmask 1047559   ;;  %531 = vmatpush3.bf16.msra.mxu1 %v592_v33  ;;  %v288_v40 = vpack.c.bf16 %v287_v38, %v287_v38 }
  0x48   :  { %v184_v25 = vsel %vm183_vm2, %v175_v17, %v182_v22  ;;  %532 = vmatprep.subr.bf16.mxu1 %v593_v34  ;;  %p695_p10 = pnand %p694_p9, %p688_p6 }
  0x49   :  { %v186_v27 = vsel %vm185_vm3, %v176_v19, %v184_v25  ;;  %456 = vmatprep.mubr.bf16.mxu1 %v288_v40 }
  0x4a   :  { %557 = vmatpush3.bf16.msra.mxu0 %v582_v54  ;;  %v188_v28 = vsel %vm187_vm4, %v177_v20, %v186_v27 }
  0x4b   :  { %558 = vmatprep.subr.bf16.mxu0 %v723_v0  ;;  %v190_v29 = vsel %vm189_vm5, %v178_v21, %v188_v28  ;;  %533 = vmatpush3.bf16.msra.mxu1 %v594_v35 }
  0x4c   :  { %v192_v30 = vsel %vm191_vm6, %v179_v24, %v190_v29 }
  0x4d   :  { %v194_v31 = vsel %vm193_vm7, %v180_v26, %v192_v30 }
  0x4e   :  { %559 = vmatpush3.bf16.msra.mxu0 %v583_v1  ;;  %v195_v32 = vpack.c.b16 %v194_v31, %v194_v31 }
  0x4f   :  { %560 = vmatprep.subr.bf16.mxu0 %v723_v0  ;;  %v595_v0 = vld [vmem:[#allocation8 + $0x50] sm:$0xff]  }
  0x50   :  { %534 = vmatprep.subr.bf16.mxu1 %v595_v0 }
  0x51   :  { %535 = vmatpush3.bf16.msra.mxu1 %v596_v36 }
  0x52   :  { %561 = vmatpush3.bf16.msra.mxu0 %v584_v23  ;;  %536 = vmatprep.subr.bf16.mxu1 %v597_v37 }
  0x55   :  { %563 = vmatmul.mubr.bf16.vlgmr.msra.gmra.mxu0 %v195_v32  ;;  %537 = vmatpush3.bf16.msra.mxu1 %v598_v39 }
  0x56   :  { %538 = vmatprep.subr.bf16.mxu1 %v599_v41 }
  0x59   :  { %539 = vmatpush3.bf16.msra.mxu1 %v600_v42 }
 0x115   :  { %v279_v44 = vpop.f32.mrf.mxu0 }
 0x116   :  { %v280_v45 = vadd.f32 %v489_v43, %v279_v44 }
 0x117   :  { %v564_v46 = vpop.f32.mrf.mxu0 }
 0x118   :  { %601 = vtanh.f32 %v280_v45 }
 0x119   :  { %v282_v47 = vpop.f32.mrf.mxu0 }
 0x11b   :  { %v565_v48 = vpop.f32.mrf.mxu0 }
 0x125   :  { %v602_v49 = vpop.eup %601 }
 0x126   :  { %v286_v50 = vpack.c.bf16 %v602_v49, %v602_v49 }
 0x128   :  { %457 = vmatmul.mubr.bf16.vlgmr.msra.gmra.mxu1 %v286_v50 }
 0x1e8   :  { %v540_v51 = vpop.f32.mrf.mxu1 }
 0x1ea   :  { %v541_v53 = vpop.f32.mrf.mxu1 }
 0x1eb   :  { %v542_v54 = vadd.f32 %v541_v53, %v540_v51 }
 0x1ec   :  { %v543_v55 = vpop.f32.mrf.mxu1 }
 0x1ed   :  { %v459_v56 = vadd.f32 %v542_v54, %v498_v52 }
 0x1ee   :  { %v544_v57 = vpop.f32.mrf.mxu1 }
 0x1ef   :  { %603 = vtanh.f32 %v459_v56 }
 0x1fc   :  { %v604_v58 = vpop.eup %603 }
 0x1fd   :  { %v465_v59 = vmul.f32 %v604_v58, %v604_v58 }
 0x1ff   :  { %466 = vadd.xlane.f32.xlu0 %v465_v59 }
 0x288   :  { %v467_v60 = vpop.xlane.xlu0 %466 }
 0x289   :  { %v468_v61 = vmax.f32 %v467_v60, 1e-24 }
 0x28b   :  { %605 = vrsqrt.f32 %v468_v61 }
 0x298   :  { %v606_v62 = vpop.eup %605 }
 0x299   :  { %v470_v63 = vmul.f32 %v606_v62, %v604_v58 }
 0x29b   :  { %471 = vst [vmem:[#allocation10] sm:$0xff] %v470_v63 }
 0x29c   :  { %698 = shalt.err (!%p695_p10)
}
 0x29d   :  { %481 = dma.vmem_to_hbm [thread:$0]  %s479_s21, 128, %s801_s6, [#allocation4]  }
 0x29e   :  { %713 = dma.done.wait [#allocation4], 128  }
 0x29f   :  { %714 = vsyncadd [#allocation4], 4294967168 }
 0x2a0   :  { %485 = vsyncpa [#allocation3], 1 }
 0x2a1   :  { %486 = vsyncpa [#allocation6], 1 }
 0x2a2   :  { %487 = vsyncpa [#allocation9], 1 }
 0x2a3   :  { %488 = vsyncpa [#allocation4], 1 }

</bundles_post_ra>
